<compile_context>
chip_gen: v7x
topology: tpu7x:2x2x1
jax: 0.10.0
libtpu: 0.0.40
codegen_flags: <defaults>
</compile_context>

<pallas_src>
import functools

import jax
import jax.numpy as jnp
from jax.experimental import pallas as pl
from jax.experimental.pallas import tpu as pltpu


def _cbn_kernel(x_ref, g_ref, b_ref, o_ref, *, eps):
    # x_ref / o_ref: (N, c_blk, HW)    g_ref / b_ref: (N, c_blk, 1)
    x = x_ref[...].astype(jnp.float32)
    count = x.shape[0] * x.shape[2]  # N * H * W (static)
    inv_count = 1.0 / count

    # Per-channel batch statistics over (N, HW), single pass over x.
    # Reduce the leading batch axis first (cheap vreg adds), then the lane axis.
    x_sum_n = jnp.sum(x, axis=0, keepdims=True)          # (1, c_blk, HW)
    x2_sum_n = jnp.sum(x * x, axis=0, keepdims=True)     # (1, c_blk, HW)
    s1 = jnp.sum(x_sum_n, axis=2, keepdims=True)         # (1, c_blk, 1)
    s2 = jnp.sum(x2_sum_n, axis=2, keepdims=True)        # (1, c_blk, 1)

    mean = s1 * inv_count
    # Biased variance (BatchNorm2d normalization); clamp guards cancellation.
    var = jnp.maximum(s2 * inv_count - mean * mean, 0.0)
    inv_std = jax.lax.rsqrt(var + eps)                    # (1, c_blk, 1)

    g = g_ref[...].astype(jnp.float32)                    # (N, c_blk, 1)
    b = b_ref[...].astype(jnp.float32)                    # (N, c_blk, 1)

    # Fused normalize + conditional affine: out = x * scale + bias.
    scale = g * inv_std                                   # (N, c_blk, 1)
    bias = b - mean * scale                               # (N, c_blk, 1)

    o_ref[...] = (x * scale + bias).astype(o_ref.dtype)


def _choose_c_blk(C, N, HW, itemsize, target_block_bytes=4 << 20):
    """Largest multiple-of-8 divisor of C whose (N, c_blk, HW) block fits the budget."""
    if C <= 8:
        return C  # full-C block satisfies the "equal full dim" rule
    per_c_bytes = N * HW * itemsize
    budget_c = max(8, target_block_bytes // per_c_bytes)
    best = 0
    for c in range(8, C + 1, 8):
        if C % c == 0 and c <= budget_c:
            best = c
    if best:
        return best
    # No multiple-of-8 divisor of C exists (odd channel counts): one full block.
    return C


def conditional_batch_norm_2d(x, y, gamma_table, beta_table, *, eps=1e-5):
    """x: (N, C, H, W) float; y: (N,) int class ids.

    gamma_table/beta_table: (n_classes, C) embedding weights.
    Returns (N, C, H, W), matching PyTorch ConditionalBatchNorm2d.forward in train mode.
    """
    N, C, H, W = x.shape
    HW = H * W

    # Glue: embedding lookup (tiny) kept in plain JAX; no big-tensor transposes.
    gamma_sel = jnp.take(gamma_table, y, axis=0)          # (N, C)
    beta_sel = jnp.take(beta_table, y, axis=0)            # (N, C)

    x_ncl = x.reshape(N, C, HW)                           # free reshape, NCHW-contiguous
    g_nc1 = gamma_sel.reshape(N, C, 1)
    b_nc1 = beta_sel.reshape(N, C, 1)

    c_blk = _choose_c_blk(C, N, HW, x.dtype.itemsize)
    grid = (pl.cdiv(C, c_blk),)                           # exact by construction

    kernel = functools.partial(_cbn_kernel, eps=eps)

    out_ncl = pl.pallas_call(
        kernel,
        out_shape=jax.ShapeDtypeStruct((N, C, HW), x.dtype),
        grid_spec=pltpu.PrefetchScalarGridSpec(
            num_scalar_prefetch=0,
            grid=grid,
            in_specs=[
                pl.BlockSpec((N, c_blk, HW), lambda i: (0, i, 0)),
                pl.BlockSpec((N, c_blk, 1), lambda i: (0, i, 0)),
                pl.BlockSpec((N, c_blk, 1), lambda i: (0, i, 0)),
            ],
            out_specs=pl.BlockSpec((N, c_blk, HW), lambda i: (0, i, 0)),
        ),
        compiler_params=pltpu.CompilerParams(
            dimension_semantics=("parallel",),
        ),
    )(x_ncl, g_nc1, b_nc1)

    return out_ncl.reshape(N, C, H, W)


def _reference(x, y, gamma_table, beta_table, eps=1e-5):
    # Pure-JAX reference of the PyTorch forward (train-mode BatchNorm2d, affine=False).
    xf = x.astype(jnp.float32)
    mean = jnp.mean(xf, axis=(0, 2, 3), keepdims=True)
    var = jnp.mean((xf - mean) ** 2, axis=(0, 2, 3), keepdims=True)
    x_hat = (xf - mean) * jax.lax.rsqrt(var + eps)
    g = jnp.take(gamma_table, y, axis=0)[:, :, None, None]
    b = jnp.take(beta_table, y, axis=0)[:, :, None, None]
    return (g * x_hat + b).astype(x.dtype)


if __name__ == "__main__":
    key = jax.random.PRNGKey(0)
    kx, ky = jax.random.split(key)

    N, C, H, W = 2, 4, 16, 16
    n_classes = 10

    x = jax.random.normal(kx, (N, C, H, W), dtype=jnp.float32)
    y = jax.random.randint(ky, (N,), 0, n_classes, dtype=jnp.int32)

    # Module __init__: gamma.weight filled with 1, beta.weight filled with 0.
    gamma_table = jnp.ones((n_classes, C), dtype=jnp.float32)
    beta_table = jnp.zeros((n_classes, C), dtype=jnp.float32)

    # TODO(synk): running_mean/running_var momentum update is a training side effect
    # (does not affect the forward output in train mode) and is not implemented here.

    out = conditional_batch_norm_2d(x, y, gamma_table, beta_table, eps=1e-5)
    out = jax.block_until_ready(out)

    ref = _reference(x, y, gamma_table, beta_table, eps=1e-5)
    assert out.shape == (N, C, H, W)
    assert jnp.allclose(out, ref, atol=1e-5, rtol=1e-5)

    print("KERNEL_OK")
</pallas_src>

<mosaic_0001>
module attributes {stable_mosaic.version = 11 : i64} {
  func.func @_cbn_kernel(%arg0: i32, %arg1: memref<2x4x256xf32, #tpu.memory_space<vmem>>, %arg2: memref<2x4x1xf32, #tpu.memory_space<vmem>>, %arg3: memref<2x4x1xf32, #tpu.memory_space<vmem>>, %arg4: memref<2x4x256xf32, #tpu.memory_space<vmem>>) attributes {dimension_semantics = [#tpu.dimension_semantics<parallel>], iteration_bounds = array<i64: 1>, scalar_prefetch = 0 : i64, scratch_operands = 0 : i64, tpu.core_type = #tpu.core_type<tc>, window_params = [{transform_indices = @transform_0, window_bounds = array<i64: 2, 4, 256>}, {transform_indices = @transform_1, window_bounds = array<i64: 2, 4, 1>}, {transform_indices = @transform_2, window_bounds = array<i64: 2, 4, 1>}, {transform_indices = @transform_3, window_bounds = array<i64: 2, 4, 256>}]} {
    %c0 = arith.constant 0 : index
    %c0_0 = arith.constant 0 : index
    %c0_1 = arith.constant 0 : index
    %0 = vector.load %arg1[%c0, %c0_0, %c0_1] : memref<2x4x256xf32, #tpu.memory_space<vmem>>, vector<2x4x256xf32>
    %cst = arith.constant dense<0.000000e+00> : vector<4x256xf32>
    %1 = vector.multi_reduction <add>, %0, %cst [0] : vector<2x4x256xf32> to vector<4x256xf32>
    %2 = vector.shape_cast %1 : vector<4x256xf32> to vector<1x4x256xf32>
    %3 = arith.mulf %0, %0 : vector<2x4x256xf32>
    %cst_2 = arith.constant dense<0.000000e+00> : vector<4x256xf32>
    %4 = vector.multi_reduction <add>, %3, %cst_2 [0] : vector<2x4x256xf32> to vector<4x256xf32>
    %5 = vector.shape_cast %4 : vector<4x256xf32> to vector<1x4x256xf32>
    %cst_3 = arith.constant dense<0.000000e+00> : vector<1x4xf32>
    %6 = vector.multi_reduction <add>, %2, %cst_3 [2] : vector<1x4x256xf32> to vector<1x4xf32>
    %7 = vector.shape_cast %6 : vector<1x4xf32> to vector<1x4x1xf32>
    %cst_4 = arith.constant dense<0.000000e+00> : vector<1x4xf32>
    %8 = vector.multi_reduction <add>, %5, %cst_4 [2] : vector<1x4x256xf32> to vector<1x4xf32>
    %9 = vector.shape_cast %8 : vector<1x4xf32> to vector<1x4x1xf32>
    %cst_5 = arith.constant 0.001953125 : f32
    %10 = vector.broadcast %cst_5 : f32 to vector<1x4x1xf32>
    %11 = arith.mulf %7, %10 : vector<1x4x1xf32>
    %cst_6 = arith.constant 0.001953125 : f32
    %12 = vector.broadcast %cst_6 : f32 to vector<1x4x1xf32>
    %13 = arith.mulf %9, %12 : vector<1x4x1xf32>
    %14 = arith.mulf %11, %11 : vector<1x4x1xf32>
    %15 = arith.subf %13, %14 : vector<1x4x1xf32>
    %cst_7 = arith.constant 0.000000e+00 : f32
    %16 = vector.broadcast %cst_7 : f32 to vector<1x4x1xf32>
    %17 = arith.maximumf %15, %16 : vector<1x4x1xf32>
    %cst_8 = arith.constant 9.99999974E-6 : f32
    %18 = vector.broadcast %cst_8 : f32 to vector<1x4x1xf32>
    %19 = arith.addf %17, %18 : vector<1x4x1xf32>
    %20 = math.rsqrt %19 : vector<1x4x1xf32>
    %c0_9 = arith.constant 0 : index
    %c0_10 = arith.constant 0 : index
    %c0_11 = arith.constant 0 : index
    %21 = vector.load %arg2[%c0_9, %c0_10, %c0_11] : memref<2x4x1xf32, #tpu.memory_space<vmem>>, vector<2x4x1xf32>
    %c0_12 = arith.constant 0 : index
    %c0_13 = arith.constant 0 : index
    %c0_14 = arith.constant 0 : index
    %22 = vector.load %arg3[%c0_12, %c0_13, %c0_14] : memref<2x4x1xf32, #tpu.memory_space<vmem>>, vector<2x4x1xf32>
    %23 = vector.broadcast %20 : vector<1x4x1xf32> to vector<2x4x1xf32>
    %24 = arith.mulf %21, %23 : vector<2x4x1xf32>
    %25 = vector.broadcast %11 : vector<1x4x1xf32> to vector<2x4x1xf32>
    %26 = arith.mulf %25, %24 : vector<2x4x1xf32>
    %27 = arith.subf %22, %26 : vector<2x4x1xf32>
    %28 = vector.broadcast %24 : vector<2x4x1xf32> to vector<2x4x256xf32>
    %29 = arith.mulf %0, %28 : vector<2x4x256xf32>
    %30 = vector.broadcast %27 : vector<2x4x1xf32> to vector<2x4x256xf32>
    %31 = arith.addf %29, %30 : vector<2x4x256xf32>
    %c0_15 = arith.constant 0 : index
    %c0_16 = arith.constant 0 : index
    %c0_17 = arith.constant 0 : index
    %32 = vector.load %arg4[%c0_15, %c0_16, %c0_17] : memref<2x4x256xf32, #tpu.memory_space<vmem>>, vector<2x4x256xf32>
    tpu.vector_store %arg4[%c0_15, %c0_16, %c0_17], %31 {strides = array<i32>} : memref<2x4x256xf32, #tpu.memory_space<vmem>>, vector<2x4x256xf32>,
    return
  }
  func.func @transform_0(%arg0: i32) -> (i32, i32, i32) {
    %c0_i32 = arith.constant 0 : i32
    %c0_i32_0 = arith.constant 0 : i32
    %c0_i32_1 = arith.constant 0 : i32
    return %c0_i32, %arg0, %c0_i32_0 : i32, i32, i32
  }
  func.func @transform_1(%arg0: i32) -> (i32, i32, i32) {
    %c0_i32 = arith.constant 0 : i32
    %c0_i32_0 = arith.constant 0 : i32
    %c0_i32_1 = arith.constant 0 : i32
    return %c0_i32, %arg0, %c0_i32_0 : i32, i32, i32
  }
  func.func @transform_2(%arg0: i32) -> (i32, i32, i32) {
    %c0_i32 = arith.constant 0 : i32
    %c0_i32_0 = arith.constant 0 : i32
    %c0_i32_1 = arith.constant 0 : i32
    return %c0_i32, %arg0, %c0_i32_0 : i32, i32, i32
  }
  func.func @transform_3(%arg0: i32) -> (i32, i32, i32) {
    %c0_i32 = arith.constant 0 : i32
    %c0_i32_0 = arith.constant 0 : i32
    %c0_i32_1 = arith.constant 0 : i32
    return %c0_i32, %arg0, %c0_i32_0 : i32, i32, i32
  }
}

</mosaic_0001>

<bundles_post_ra>
// kernel: tpu_custom_call.1
= control target key start
LH: loop header
LB: loop body
LE: loop exit
PB: predicated region body
PF: predicated region fallthrough
CT: control target
= control target key end

     0   :  { %vm23_vm0 = vcmask 1043456   ;;  %s259_s0 = inlined_call_operand.vmem [shape: f32[2,4,256], index: 0, kind: input, shape index: {}]   ;;  %s260_s1 = inlined_call_operand.vmem [shape: f32[2,4,1], index: 1, kind: input, shape index: {}]   ;;  %s261_s2 = inlined_call_operand.vmem [shape: f32[2,4,1], index: 2, kind: input, shape index: {}]   ;;  %s262_s3 = inlined_call_operand.hbm [shape: f32[2,4,256], index: 3, kind: output, shape index: {}]  }
   0x1   :  { %v204_v0 = vld [vmem:[%s259_s0] sm:$0xff]  ;;  %v209_v1 = vld [vmem:[%s259_s0 + $0x8] sm:$0xff] }
   0x2   :  { %8 = vsyncpa [#allocation3], 0  ;;  %v19_v2 = vcombine.high %v204_v0, %v204_v0  ;;  %v20_v3 = vcombine.high %v209_v1, %v209_v1  ;;  %v24_v4 = vsel %vm23_vm0, %v204_v0, 0.0  ;;  %v25_v5 = vsel %vm23_vm0, %v209_v1, 0.0  ;;  %v61_v35 = vld [vmem:[%s260_s1] sm:$0xf] }
   0x3   :  { %v26_v6 = vadd.f32 %v25_v5, %v24_v4  ;;  %v30_v7 = vmul.f32 %v204_v0, %v204_v0  ;;  %v31_v8 = vmul.f32 %v209_v1, %v209_v1  ;;  %v176_v26 = vmov 0   ;;  %v62_v36 = vld [vmem:[%s260_s1 + $0x4] sm:$0xf]  ;;  %v63_v40 = vld [vmem:[%s261_s2] sm:$0xf]  ;;  %s178_s1 = smov [#allocation2]  }
   0x4   :  { %v27_v9 = vsel %vm23_vm0, %v19_v2, 0.0  ;;  %v28_v10 = vsel %vm23_vm0, %v20_v3, 0.0  ;;  %146 = vset.pattern.permute.xlu1 %v176_v26  ;;  %147 = vset.pattern.permute.xlu0 %v176_v26  ;;  %v64_v44 = vld [vmem:[%s261_s2 + $0x4] sm:$0xf]  ;;  %v177_v46 = vmov 839922192   ;;  %v82_v48 = vlaneseq }
   0x5   :  { %v29_v11 = vadd.f32 %v28_v10, %v27_v9  ;;  %v44_v12 = vsel %vm23_vm0, %v26_v6, 0.0  ;;  %v34_v13 = vcombine.high %v30_v7, %v30_v7  ;;  %v35_v14 = vcombine.high %v31_v8, %v31_v8  ;;  %s130_s2 = sshll.u32 %s178_s1, 4  ;;  %s131_s2 = int_to_ptr.vmem [resolvable:$true] %s130_s2 }
   0x6   :  { %v38_v15 = vsel %vm23_vm0, %v30_v7, 0.0  ;;  %v39_v16 = vsel %vm23_vm0, %v31_v8, 0.0  ;;  %v80_v47 = vunpack.c.l.s4 %v177_v46  ;;  %v83_v50 = vshrl.u32 %v82_v48, 7  ;;  %s152_s23 = scalar_lea.vmem %s131_s2, 256  ;;  %p157_p1 = scmp.lt.s32.totalorder %s131_s2, %s131_s2 }
   0x7   :  { %v45_v17 = vsel %vm23_vm0, %v29_v11, 0.0  ;;  %v40_v18 = vadd.f32 %v39_v16, %v38_v15  ;;  %v41_v19 = vsel %vm23_vm0, %v34_v13, 0.0  ;;  %v42_v20 = vsel %vm23_vm0, %v35_v14, 0.0  ;;  %p153_p0 = scmp.ne.s32.totalorder %s131_s2, %s152_s23  ;;  %p158_p2 = scmp.lt.s32.totalorder %s152_s23, %s152_s23 }
   0x8   :  { %v46_v21 = vadd.f32 %v45_v17, %v44_v12  ;;  %v43_v22 = vadd.f32 %v42_v20, %v41_v19  ;;  %v81_v49 = vunpack.c.0.s8 %v80_v47 }
   0x9   :  { %v49_v23 = vsel %vm23_vm0, %v40_v18, 0.0  ;;  %p159_p3 = por %p158_p2, %p157_p1 }
   0xa   :  { %47 = vadd.xlane.f32.xlu0 %v46_v21  ;;  %v50_v24 = vsel %vm23_vm0, %v43_v22, 0.0  ;;  %v84_v51 = vsub.s32 %v81_v49, %v83_v50 }
   0xb   :  { %v51_v25 = vadd.f32 %v50_v24, %v49_v23  ;;  %p160_p4 = pnand %p159_p3, %p153_p0 }
   0xe   :  { %52 = vadd.xlane.f32.xlu0 %v51_v25 }
  0x97   :  { %v48_v27 = vpop.xlane.xlu0 %47 }
  0x98   :  { %v54_v28 = vmul.f32 0.001953125, %v48_v27 }
  0x9a   :  { %v56_v30 = vmul.f32 %v54_v28, %v54_v28 }
  0x9b   :  { %v53_v29 = vpop.xlane.xlu0 %52 }
  0x9c   :  { %v55_v31 = vmul.f32 0.001953125, %v53_v29 }
  0x9e   :  { %v57_v32 = vsub.f32 %v55_v31, %v56_v30 }
  0xa0   :  { %v58_v33 = vmax.f32 %v57_v32, 0.0 }
  0xa2   :  { %v59_v34 = vadd.f32 1e-05, %v58_v33 }
  0xa4   :  { %150 = vrsqrt.f32 %v59_v34 }
  0xae   :  { %v151_v37 = vpop.eup %150 }
  0xaf   :  { %v65_v38 = vmul.f32 %v151_v37, %v61_v35  ;;  %v66_v39 = vmul.f32 %v151_v37, %v62_v36 }
  0xb1   :  { %73 = vperm.xlu1 %146, %v65_v38   ;;  %v67_v41 = vmul.f32 %v65_v38, %v54_v28  ;;  %v68_v43 = vmul.f32 %v66_v39, %v54_v28 }
  0xb3   :  { %v69_v42 = vsub.f32 %v63_v40, %v67_v41  ;;  %v70_v45 = vsub.f32 %v64_v44, %v68_v43 }
  0xb5   :  { %77 = vperm.xlu1 %146, %v66_v39   ;;  %99 = vperm.xlu0 %147, %v69_v42  }
  0xb9   :  { %103 = vperm.xlu1 %146, %v70_v45  }
 0x130   :  { %v74_v52 = vpop.permute.xlu1 %73 }
 0x131   :  { %v85_v53 = vrot.slane %v74_v52, %v84_v51 }
 0x133   :  { %v95_v56 = vmul.f32 %v85_v53, %v204_v0 }
 0x134   :  { %v78_v54 = vpop.permute.xlu1 %77  ;;  %v100_v55 = vpop.permute.xlu0 %99 }
 0x135   :  { %v92_v57 = vrot.slane %v78_v54, %v84_v51  ;;  %v111_v58 = vrot.slane %v100_v55, %v84_v51 }
 0x137   :  { %v121_v59 = vadd.f32 %v111_v58, %v95_v56  ;;  %v96_v61 = vmul.f32 %v92_v57, %v209_v1 }
 0x138   :  { %v104_v60 = vpop.permute.xlu1 %103 }
 0x139   :  { %123 = vst [vmem:[#allocation2] sm:$0xff] %v121_v59  ;;  %v118_v62 = vrot.slane %v104_v60, %v84_v51 }
 0x13b   :  { %v122_v63 = vadd.f32 %v118_v62, %v96_v61 }
 0x13d   :  { %124 = vst [vmem:[#allocation2 + $0x8] sm:$0xff] %v122_v63 }
 0x13e   :  { %163 = shalt.err (!%p160_p4)
}
 0x13f   :  { %s164_s26 = scalar_lea.hbm %s262_s3, 256 }
 0x140   :  { %p165_p5 = scmp.ne.s32.totalorder %s262_s3, %s164_s26  ;;  %p168_p6 = scmp.lt.u32.totalorder %s164_s26, %s262_s3 }
 0x142   :  { %p170_p7 = pnand %p168_p6, %p165_p5 }
 0x144   :  { %173 = shalt.err (!%p170_p7)
}
 0x145   :  { %s179_s4 = smov 128   ;;  %s180_s5 = smov 8  }
 0x146   :  { %136 = dma.vmem_to_hbm [thread:$0]  %s131_s2, 256, %s262_s3, [#allocation3], %s179_s4, %s179_s4, %s180_s5  }
 0x147   :  { %174 = dma.done.wait [#allocation3], 256  }
 0x148   :  { %175 = vsyncadd [#allocation3], 4294967040 }
 0x149   :  { %140 = vsyncpa [#allocation3], 1 }

</bundles_post_ra>
